<compile_context>
chip_gen: v7x
topology: tpu7x:2x2x1
jax: 0.10.0
libtpu: 0.0.40
codegen_flags: <defaults>
</compile_context>

<pallas_src>
import math

import numpy as np
import jax
import jax.numpy as jnp
from jax.experimental import pallas as pl
from jax.experimental.pallas import tpu as pltpu

MAX_K = 11            # largest branch kernel size
PAD = MAX_K // 2      # 5 -> "same" padding of the fused conv
LANE_TILE_CAP = 16 * 1024   # max lanes per tile (VMEM ~7 MiB at Cin=4)


# --------------------------------------------------------------------------
# Kernel: one lane tile of the flat (batch-folded) sequence axis.
#   x_ref   : (Cin, T)         input tile, batch folded into lanes (streamed)
#   m_ref   : (MAX_K, T)       0/1 tap-validity mask (VMEM-resident)
#   w_ref   : (OC, MAX_K*Cin)  flattened fused weights (VMEM-resident)
#   o_ref   : (OC, T)          output tile (lane-dense)
#   slab_ref: (MAX_K*Cin, T)   VMEM scratch: im2col slab
# --------------------------------------------------------------------------
def _inception_kernel(x_ref, m_ref, w_ref, o_ref, slab_ref):
    cin, t = x_ref.shape
    x = x_ref[...]                       # (Cin, T), loaded once, rolled 10x

    # Build the im2col slab with full-width stores.  Tap k needs x shifted by
    # (k - PAD); the shift is a lane rotation (XLU), and taps falling outside
    # their batch element are zeroed by the mask row.  Since the tile width is
    # a multiple of L, every wrap-around column is a mask==0 column, so no
    # zero-init of the slab is required.
    for k in range(MAX_K):               # static unroll over the 11 taps
        rows = slice(k * cin, (k + 1) * cin)
        if k == PAD:
            # center tap: no shift, mask row is all ones
            slab_ref[rows, :] = x
        else:
            shifted = pltpu.roll(x, shift=(PAD - k) % t, axis=1)
            slab_ref[rows, :] = shifted * m_ref[k:k + 1, :]

    # Single MXU matmul: (OC, Cin*K) x (Cin*K, T) -> (OC, T)
    o_ref[...] = jnp.dot(
        w_ref[...], slab_ref[...],
        preferred_element_type=jnp.float32).astype(o_ref.dtype)


def _choose_tile_and_pad(nl, L, cap=LANE_TILE_CAP):
    """Lane-tile size T: a multiple of L (tile edges == batch edges, so the
    in-kernel halo masking and roll wrap-around are exact) AND of 128
    (lane-dense stores).  Grow T while it still leaves >= 2 grid tiles
    (double-buffered pipelining + v7x megacore sharding), capped for VMEM.
    Returns (T, padded lane count NL_pad), NL_pad always a multiple of T."""
    base = math.lcm(L, 128)
    nl_base = ((nl + base - 1) // base) * base
    t = base
    while t * 2 <= cap and nl_base >= 2 * (t * 2):
        t *= 2
    t = min(t, nl_base)
    nl_pad = ((nl_base + t - 1) // t) * t
    return t, nl_pad


def _make_tap_mask(T, L, dtype):
    """mask[k, m] = 1 if tap k at column m (position within its batch element
    is m % L) stays inside [0, L).  Periodic with period L, so one (MAX_K, T)
    block (T % L == 0) is exact for every grid tile -> kept VMEM-resident."""
    cols = np.arange(T) % L
    shift = np.arange(MAX_K)[:, None] - PAD
    valid = (cols[None, :] + shift >= 0) & (cols[None, :] + shift < L)
    return jnp.asarray(valid.astype(np.float32), dtype=dtype)


def inception_forward(x, w_packed):
    """x: (B, Cin, L), w_packed: (11, Cin, MAX_K) -> (B, 11, L)."""
    B, Cin, L = x.shape
    OC = w_packed.shape[0]

    NL = B * L
    T, NL_pad = _choose_tile_and_pad(NL, L)

    # Fold batch into the lane axis: (Cin, B*L), zero-padded to NL_pad so every
    # grid tile (and every output store) is lane-dense.
    x_flat = jnp.transpose(x, (1, 0, 2)).reshape(Cin, NL)
    x_flat = jnp.pad(x_flat, ((0, 0), (0, NL_pad - NL)))

    # Flatten weights to 2D, tap-major: w2d[:, k*Cin + c] = w_packed[:, c, k]
    w2d = jnp.transpose(w_packed, (0, 2, 1)).reshape(OC, MAX_K * Cin)

    mask = _make_tap_mask(T, L, x.dtype)          # (MAX_K, T), VMEM-resident

    grid = (NL_pad // T,)

    out_flat = pl.pallas_call(
        _inception_kernel,
        out_shape=jax.ShapeDtypeStruct((OC, NL_pad), x.dtype),
        grid=grid,
        in_specs=[
            pl.BlockSpec((Cin, T), lambda i: (0, i)),            # streamed
            pl.BlockSpec((MAX_K, T), lambda i: (0, 0)),          # resident
            pl.BlockSpec((OC, MAX_K * Cin), lambda i: (0, 0)),   # resident
        ],
        out_specs=pl.BlockSpec((OC, T), lambda i: (0, i)),
        scratch_shapes=[pltpu.VMEM((MAX_K * Cin, T), x.dtype)],
        compiler_params=pltpu.CompilerParams(
            dimension_semantics=("parallel",),
            vmem_limit_bytes=32 * 1024 * 1024),
    )(x_flat, mask, w2d)

    # Unfold batch from the lane axis: (OC, B*L) -> (B, OC, L)
    out = out_flat[:, :NL].reshape(OC, B, L)
    return jnp.transpose(out, (1, 0, 2))


def make_inception_weights(key, cnn_in, dtype=jnp.float32):
    """Deterministic weights matching the PyTorch module's branch shapes,
    zero-padded (centered) to kernel size MAX_K and concatenated on out-ch."""
    branch_specs = [(1, 1), (2, 3), (2, 5), (2, 7), (2, 9), (2, 11)]
    packed = []
    for oc, k in branch_specs:
        key, sub = jax.random.split(key)
        fan_in = cnn_in * k
        bound = 1.0 / (fan_in ** 0.5)        # PyTorch Conv1d default init range
        w = jax.random.uniform(sub, (oc, cnn_in, k), dtype, -bound, bound)
        pad = (MAX_K - k) // 2
        packed.append(jnp.pad(w, ((0, 0), (0, 0), (pad, pad))))
    return jnp.concatenate(packed, axis=0)   # (11, cnn_in, MAX_K)


def _reference_forward(x, w_packed):
    # plain-JAX reference: single fused conv1d, "same" padding
    return jax.lax.conv_general_dilated(
        x, w_packed, window_strides=(1,), padding=[(PAD, PAD)],
        dimension_numbers=("NCW", "OIW", "NCW"))


if __name__ == "__main__":
    key = jax.random.PRNGKey(0)
    kx, kw, kx2 = jax.random.split(key, 3)

    # Small primary test (matches the module's implied shapes).
    B, CNN_IN, L = 2, 4, 16
    x = jax.random.normal(kx, (B, CNN_IN, L), jnp.float32)
    w_packed = make_inception_weights(kw, CNN_IN)

    out = inception_forward(x, w_packed)
    out = jax.block_until_ready(out)
    ref = _reference_forward(x, w_packed)
    assert out.shape == (B, 11, L)
    assert jnp.allclose(out, ref, atol=1e-5, rtol=1e-5)

    # Secondary multi-tile test: exercises the resident mask, roll wrap-around
    # masking at tile/batch edges, and a >1 grid (pipelining / megacore path).
    B2, L2 = 3, 640
    x2 = jax.random.normal(kx2, (B2, CNN_IN, L2), jnp.float32)
    out2 = jax.block_until_ready(inception_forward(x2, w_packed))
    ref2 = _reference_forward(x2, w_packed)
    assert out2.shape == (B2, 11, L2)
    assert jnp.allclose(out2, ref2, atol=1e-5, rtol=1e-5)

    print("KERNEL_OK")
</pallas_src>

<mosaic_0001>
module attributes {stable_mosaic.version = 11 : i64} {
  func.func @_inception_kernel(%arg0: i32, %arg1: memref<4x128xf32, #tpu.memory_space<vmem>>, %arg2: memref<11x128xf32, #tpu.memory_space<vmem>>, %arg3: memref<11x44xf32, #tpu.memory_space<vmem>>, %arg4: memref<11x128xf32, #tpu.memory_space<vmem>>, %arg5: memref<44x128xf32, #tpu.memory_space<vmem>>) attributes {dimension_semantics = [#tpu.dimension_semantics<parallel>], iteration_bounds = array<i64: 1>, scalar_prefetch = 0 : i64, scratch_operands = 1 : i64, tpu.core_type = #tpu.core_type<tc>, window_params = [{transform_indices = @transform_0, window_bounds = array<i64: 4, 128>}, {pipeline_mode = #tpu.pipeline_mode<synchronous>, transform_indices = @transform_1, window_bounds = array<i64: 11, 128>}, {pipeline_mode = #tpu.pipeline_mode<synchronous>, transform_indices = @transform_2, window_bounds = array<i64: 11, 44>}, {transform_indices = @transform_3, window_bounds = array<i64: 11, 128>}]} {
    %c0 = arith.constant 0 : index
    %c0_0 = arith.constant 0 : index
    %0 = vector.load %arg1[%c0, %c0_0] : memref<4x128xf32, #tpu.memory_space<vmem>>, vector<4x128xf32>
    %c5_i32 = arith.constant 5 : i32
    %1 = tpu.dynamic_rotate %0 by %c5_i32 dim 1 : vector<4x128xf32>, i32 -> vector<4x128xf32>
    %c0_1 = arith.constant 0 : index
    %c0_2 = arith.constant 0 : index
    %2 = vector.load %arg2[%c0_1, %c0_2] : memref<11x128xf32, #tpu.memory_space<vmem>>, vector<1x128xf32>
    %3 = vector.broadcast %2 : vector<1x128xf32> to vector<4x128xf32>
    %4 = arith.mulf %1, %3 : vector<4x128xf32>
    %c0_3 = arith.constant 0 : index
    %c0_4 = arith.constant 0 : index
    %5 = vector.load %arg5[%c0_3, %c0_4] : memref<44x128xf32, #tpu.memory_space<vmem>>, vector<4x128xf32>
    tpu.vector_store %arg5[%c0_3, %c0_4], %4 {strides = array<i32>} : memref<44x128xf32, #tpu.memory_space<vmem>>, vector<4x128xf32>,
    %c4_i32 = arith.constant 4 : i32
    %6 = tpu.dynamic_rotate %0 by %c4_i32 dim 1 : vector<4x128xf32>, i32 -> vector<4x128xf32>
    %c1 = arith.constant 1 : index
    %c0_5 = arith.constant 0 : index
    %7 = vector.load %arg2[%c1, %c0_5] : memref<11x128xf32, #tpu.memory_space<vmem>>, vector<1x128xf32>
    %8 = vector.broadcast %7 : vector<1x128xf32> to vector<4x128xf32>
    %9 = arith.mulf %6, %8 : vector<4x128xf32>
    %c4 = arith.constant 4 : index
    %c0_6 = arith.constant 0 : index
    %10 = vector.load %arg5[%c4, %c0_6] : memref<44x128xf32, #tpu.memory_space<vmem>>, vector<4x128xf32>
    tpu.vector_store %arg5[%c4, %c0_6], %9 {strides = array<i32>} : memref<44x128xf32, #tpu.memory_space<vmem>>, vector<4x128xf32>,
    %c3_i32 = arith.constant 3 : i32
    %11 = tpu.dynamic_rotate %0 by %c3_i32 dim 1 : vector<4x128xf32>, i32 -> vector<4x128xf32>
    %c2 = arith.constant 2 : index
    %c0_7 = arith.constant 0 : index
    %12 = vector.load %arg2[%c2, %c0_7] : memref<11x128xf32, #tpu.memory_space<vmem>>, vector<1x128xf32>
    %13 = vector.broadcast %12 : vector<1x128xf32> to vector<4x128xf32>
    %14 = arith.mulf %11, %13 : vector<4x128xf32>
    %c8 = arith.constant 8 : index
    %c0_8 = arith.constant 0 : index
    %15 = vector.load %arg5[%c8, %c0_8] : memref<44x128xf32, #tpu.memory_space<vmem>>, vector<4x128xf32>
    tpu.vector_store %arg5[%c8, %c0_8], %14 {strides = array<i32>} : memref<44x128xf32, #tpu.memory_space<vmem>>, vector<4x128xf32>,
    %c2_i32 = arith.constant 2 : i32
    %16 = tpu.dynamic_rotate %0 by %c2_i32 dim 1 : vector<4x128xf32>, i32 -> vector<4x128xf32>
    %c3 = arith.constant 3 : index
    %c0_9 = arith.constant 0 : index
    %17 = vector.load %arg2[%c3, %c0_9] : memref<11x128xf32, #tpu.memory_space<vmem>>, vector<1x128xf32>
    %18 = vector.broadcast %17 : vector<1x128xf32> to vector<4x128xf32>
    %19 = arith.mulf %16, %18 : vector<4x128xf32>
    %c12 = arith.constant 12 : index
    %c0_10 = arith.constant 0 : index
    %20 = vector.load %arg5[%c12, %c0_10] : memref<44x128xf32, #tpu.memory_space<vmem>>, vector<4x128xf32>
    tpu.vector_store %arg5[%c12, %c0_10], %19 {strides = array<i32>} : memref<44x128xf32, #tpu.memory_space<vmem>>, vector<4x128xf32>,
    %c1_i32 = arith.constant 1 : i32
    %21 = tpu.dynamic_rotate %0 by %c1_i32 dim 1 : vector<4x128xf32>, i32 -> vector<4x128xf32>
    %c4_11 = arith.constant 4 : index
    %c0_12 = arith.constant 0 : index
    %22 = vector.load %arg2[%c4_11, %c0_12] : memref<11x128xf32, #tpu.memory_space<vmem>>, vector<1x128xf32>
    %23 = vector.broadcast %22 : vector<1x128xf32> to vector<4x128xf32>
    %24 = arith.mulf %21, %23 : vector<4x128xf32>
    %c16 = arith.constant 16 : index
    %c0_13 = arith.constant 0 : index
    %25 = vector.load %arg5[%c16, %c0_13] : memref<44x128xf32, #tpu.memory_space<vmem>>, vector<4x128xf32>
    tpu.vector_store %arg5[%c16, %c0_13], %24 {strides = array<i32>} : memref<44x128xf32, #tpu.memory_space<vmem>>, vector<4x128xf32>,
    %c20 = arith.constant 20 : index
    %c0_14 = arith.constant 0 : index
    %26 = vector.load %arg5[%c20, %c0_14] : memref<44x128xf32, #tpu.memory_space<vmem>>, vector<4x128xf32>
    tpu.vector_store %arg5[%c20, %c0_14], %0 {strides = array<i32>} : memref<44x128xf32, #tpu.memory_space<vmem>>, vector<4x128xf32>,
    %c127_i32 = arith.constant 127 : i32
    %27 = tpu.dynamic_rotate %0 by %c127_i32 dim 1 : vector<4x128xf32>, i32 -> vector<4x128xf32>
    %c6 = arith.constant 6 : index
    %c0_15 = arith.constant 0 : index
    %28 = vector.load %arg2[%c6, %c0_15] : memref<11x128xf32, #tpu.memory_space<vmem>>, vector<1x128xf32>
    %29 = vector.broadcast %28 : vector<1x128xf32> to vector<4x128xf32>
    %30 = arith.mulf %27, %29 : vector<4x128xf32>
    %c24 = arith.constant 24 : index
    %c0_16 = arith.constant 0 : index
    %31 = vector.load %arg5[%c24, %c0_16] : memref<44x128xf32, #tpu.memory_space<vmem>>, vector<4x128xf32>
    tpu.vector_store %arg5[%c24, %c0_16], %30 {strides = array<i32>} : memref<44x128xf32, #tpu.memory_space<vmem>>, vector<4x128xf32>,
    %c126_i32 = arith.constant 126 : i32
    %32 = tpu.dynamic_rotate %0 by %c126_i32 dim 1 : vector<4x128xf32>, i32 -> vector<4x128xf32>
    %c7 = arith.constant 7 : index
    %c0_17 = arith.constant 0 : index
    %33 = vector.load %arg2[%c7, %c0_17] : memref<11x128xf32, #tpu.memory_space<vmem>>, vector<1x128xf32>
    %34 = vector.broadcast %33 : vector<1x128xf32> to vector<4x128xf32>
    %35 = arith.mulf %32, %34 : vector<4x128xf32>
    %c28 = arith.constant 28 : index
    %c0_18 = arith.constant 0 : index
    %36 = vector.load %arg5[%c28, %c0_18] : memref<44x128xf32, #tpu.memory_space<vmem>>, vector<4x128xf32>
    tpu.vector_store %arg5[%c28, %c0_18], %35 {strides = array<i32>} : memref<44x128xf32, #tpu.memory_space<vmem>>, vector<4x128xf32>,
    %c125_i32 = arith.constant 125 : i32
    %37 = tpu.dynamic_rotate %0 by %c125_i32 dim 1 : vector<4x128xf32>, i32 -> vector<4x128xf32>
    %c8_19 = arith.constant 8 : index
    %c0_20 = arith.constant 0 : index
    %38 = vector.load %arg2[%c8_19, %c0_20] : memref<11x128xf32, #tpu.memory_space<vmem>>, vector<1x128xf32>
    %39 = vector.broadcast %38 : vector<1x128xf32> to vector<4x128xf32>
    %40 = arith.mulf %37, %39 : vector<4x128xf32>
    %c32 = arith.constant 32 : index
    %c0_21 = arith.constant 0 : index
    %41 = vector.load %arg5[%c32, %c0_21] : memref<44x128xf32, #tpu.memory_space<vmem>>, vector<4x128xf32>
    tpu.vector_store %arg5[%c32, %c0_21], %40 {strides = array<i32>} : memref<44x128xf32, #tpu.memory_space<vmem>>, vector<4x128xf32>,
    %c124_i32 = arith.constant 124 : i32
    %42 = tpu.dynamic_rotate %0 by %c124_i32 dim 1 : vector<4x128xf32>, i32 -> vector<4x128xf32>
    %c9 = arith.constant 9 : index
    %c0_22 = arith.constant 0 : index
    %43 = vector.load %arg2[%c9, %c0_22] : memref<11x128xf32, #tpu.memory_space<vmem>>, vector<1x128xf32>
    %44 = vector.broadcast %43 : vector<1x128xf32> to vector<4x128xf32>
    %45 = arith.mulf %42, %44 : vector<4x128xf32>
    %c36 = arith.constant 36 : index
    %c0_23 = arith.constant 0 : index
    %46 = vector.load %arg5[%c36, %c0_23] : memref<44x128xf32, #tpu.memory_space<vmem>>, vector<4x128xf32>
    tpu.vector_store %arg5[%c36, %c0_23], %45 {strides = array<i32>} : memref<44x128xf32, #tpu.memory_space<vmem>>, vector<4x128xf32>,
    %c123_i32 = arith.constant 123 : i32
    %47 = tpu.dynamic_rotate %0 by %c123_i32 dim 1 : vector<4x128xf32>, i32 -> vector<4x128xf32>
    %c10 = arith.constant 10 : index
    %c0_24 = arith.constant 0 : index
    %48 = vector.load %arg2[%c10, %c0_24] : memref<11x128xf32, #tpu.memory_space<vmem>>, vector<1x128xf32>
    %49 = vector.broadcast %48 : vector<1x128xf32> to vector<4x128xf32>
    %50 = arith.mulf %47, %49 : vector<4x128xf32>
    %c40 = arith.constant 40 : index
    %c0_25 = arith.constant 0 : index
    %51 = vector.load %arg5[%c40, %c0_25] : memref<44x128xf32, #tpu.memory_space<vmem>>, vector<4x128xf32>
    tpu.vector_store %arg5[%c40, %c0_25], %50 {strides = array<i32>} : memref<44x128xf32, #tpu.memory_space<vmem>>, vector<4x128xf32>,
    %c0_26 = arith.constant 0 : index
    %c0_27 = arith.constant 0 : index
    %52 = vector.load %arg3[%c0_26, %c0_27] : memref<11x44xf32, #tpu.memory_space<vmem>>, vector<11x44xf32>
    %c0_28 = arith.constant 0 : index
    %c0_29 = arith.constant 0 : index
    %53 = vector.load %arg5[%c0_28, %c0_29] : memref<44x128xf32, #tpu.memory_space<vmem>>, vector<44x128xf32>
    %cst = arith.constant dense<0.000000e+00> : vector<11x128xf32>
    %54 = tpu.matmul %52, %53, %cst {dimension_numbers = #tpu.dot_dimension_numbers<[1], [0], [0], [1], [0, 0, 1, 1], [], []>} : vector<11x44xf32>, vector<44x128xf32>, vector<11x128xf32> -> vector<11x128xf32>
    %c0_30 = arith.constant 0 : index
    %c0_31 = arith.constant 0 : index
    %55 = vector.load %arg4[%c0_30, %c0_31] : memref<11x128xf32, #tpu.memory_space<vmem>>, vector<11x128xf32>
    tpu.vector_store %arg4[%c0_30, %c0_31], %54 {strides = array<i32>} : memref<11x128xf32, #tpu.memory_space<vmem>>, vector<11x128xf32>,
    return
  }
  func.func @transform_0(%arg0: i32) -> (i32, i32) {
    %c0_i32 = arith.constant 0 : i32
    %c0_i32_0 = arith.constant 0 : i32
    return %c0_i32, %arg0 : i32, i32
  }
  func.func @transform_1(%arg0: i32) -> (i32, i32) {
    %c0_i32 = arith.constant 0 : i32
    %c0_i32_0 = arith.constant 0 : i32
    %c0_i32_1 = arith.constant 0 : i32
    return %c0_i32, %c0_i32_0 : i32, i32
  }
  func.func @transform_2(%arg0: i32) -> (i32, i32) {
    %c0_i32 = arith.constant 0 : i32
    %c0_i32_0 = arith.constant 0 : i32
    %c0_i32_1 = arith.constant 0 : i32
    return %c0_i32, %c0_i32_0 : i32, i32
  }
  func.func @transform_3(%arg0: i32) -> (i32, i32) {
    %c0_i32 = arith.constant 0 : i32
    %c0_i32_0 = arith.constant 0 : i32
    return %c0_i32, %arg0 : i32, i32
  }
}

</mosaic_0001>

<bundles_post_ra>
// kernel: tpu_custom_call.1
= control target key start
LH: loop header
LB: loop body
LE: loop exit
PB: predicated region body
PF: predicated region fallthrough
CT: control target
= control target key end

     0   :  { %8 = vsyncpa [#allocation4], 0  ;;  %s517_s0 = inlined_call_operand.hbm [shape: f32[4,128], index: 0, kind: input, shape index: {}]   ;;  %s518_s1 = inlined_call_operand.hbm [shape: f32[11,128], index: 1, kind: input, shape index: {}]   ;;  %s519_s2 = inlined_call_operand.hbm [shape: f32[11,44], index: 2, kind: input, shape index: {}]   ;;  %s520_s3 = inlined_call_operand.hbm [shape: f32[11,128], index: 3, kind: output, shape index: {}]  }
   0x1   :  { %9 = vsyncpa [#allocation7], 0 }
   0x2   :  { %10 = vsyncpa [#allocation5], 0  ;;  %s421_s12 = smov [#allocation6]   ;;  %s327_s16 = scalar_lea.hbm %s518_s1, 256 }
   0x3   :  { %s26_s13 = sshll.u32 %s421_s12, 4  ;;  %p328_p0 = scmp.ne.s32.totalorder %s518_s1, %s327_s16  ;;  %s27_s13 = int_to_ptr.vmem [resolvable:$true] %s26_s13 }
   0x4   :  { %p331_p1 = scmp.lt.u32.totalorder %s327_s16, %s518_s1 }
   0x6   :  { %p333_p2 = pnand %p331_p1, %p328_p0 }
   0x8   :  { %336 = shalt.err (!%p333_p2)
}
   0x9   :  { %s337_s21 = scalar_lea.vmem %s27_s13, 256  ;;  %p342_p4 = scmp.lt.s32.totalorder %s27_s13, %s27_s13 }
   0xa   :  { %p338_p3 = scmp.ne.s32.totalorder %s27_s13, %s337_s21  ;;  %p343_p5 = scmp.lt.s32.totalorder %s337_s21, %s337_s21 }
   0xc   :  { %p344_p6 = por %p343_p5, %p342_p4 }
   0xe   :  { %p345_p7 = pnand %p344_p6, %p338_p3 }
  0x10   :  { %348 = shalt.err (!%p345_p7)
}
  0x11   :  { %s422_s22 = smov 128   ;;  %s423_s23 = smov 8  }
  0x12   :  { %32 = dma.hbm_to_vmem [thread:$0]  %s518_s1, 256, %s27_s13, [#allocation7], %s422_s22, %s422_s22, %s423_s23  }
  0x13   :  { %s424_s26 = smov [#allocation3]   ;;  %s425_s28 = smov [#allocation8]  }
  0x14   :  { %s17_s27 = sshll.u32 %s424_s26, 4  ;;  %s38_s29 = sshll.u32 %s425_s28, 4  ;;  %s18_s27 = int_to_ptr.vmem [resolvable:$true] %s17_s27  ;;  %s39_s29 = int_to_ptr.vmem [resolvable:$true] %s38_s29 }
  0x15   :  { %s349_s5 = scalar_lea.hbm %s517_s0, 64 }
  0x16   :  { %p350_p8 = scmp.ne.s32.totalorder %s517_s0, %s349_s5  ;;  %p353_p9 = scmp.lt.u32.totalorder %s349_s5, %s517_s0 }
  0x18   :  { %p355_p10 = pnand %p353_p9, %p350_p8 }
  0x1a   :  { %358 = shalt.err (!%p355_p10)
}
  0x1b   :  { %s359_s1 = scalar_lea.vmem %s18_s27, 64  ;;  %p364_p12 = scmp.lt.s32.totalorder %s18_s27, %s18_s27 }
  0x1c   :  { %p360_p11 = scmp.ne.s32.totalorder %s18_s27, %s359_s1  ;;  %p365_p13 = scmp.lt.s32.totalorder %s359_s1, %s359_s1 }
  0x1e   :  { %p366_p0 = por %p365_p13, %p364_p12 }
  0x20   :  { %p367_p1 = pnand %p366_p0, %p360_p11 }
  0x22   :  { %370 = shalt.err (!%p367_p1)
}
  0x23   :  { %20 = dma.hbm_to_vmem [thread:$0]  %s517_s0, 64, %s18_s27, [#allocation4]  }
  0x24   :  { %s371_s14 = scalar_lea.hbm %s519_s2, 256 }
  0x25   :  { %p372_p2 = scmp.ne.s32.totalorder %s519_s2, %s371_s14  ;;  %p375_p3 = scmp.lt.u32.totalorder %s371_s14, %s519_s2 }
  0x27   :  { %p377_p4 = pnand %p375_p3, %p372_p2 }
  0x29   :  { %380 = shalt.err (!%p377_p4)
}
  0x2a   :  { %s381_s19 = scalar_lea.vmem %s39_s29, 256  ;;  %p386_p6 = scmp.lt.s32.totalorder %s39_s29, %s39_s29 }
  0x2b   :  { %p382_p5 = scmp.ne.s32.totalorder %s39_s29, %s381_s19  ;;  %p387_p7 = scmp.lt.s32.totalorder %s381_s19, %s381_s19 }
  0x2d   :  { %p388_p8 = por %p387_p7, %p386_p6 }
  0x2f   :  { %p389_p9 = pnand %p388_p8, %p382_p5 }
  0x31   :  { %392 = shalt.err (!%p389_p9)
}
  0x32   :  { %44 = dma.hbm_to_vmem [thread:$0]  %s519_s2, 256, %s39_s29, [#allocation7], %s422_s22, %s422_s22, %s423_s23  }
  0x33   :  { %415 = dma.done.wait [#allocation4], 64  }
  0x34   :  { %416 = vsyncadd [#allocation4], 4294967232 }
  0x35   :  { %417 = dma.done.wait [#allocation7], 512  }
  0x36   :  { %418 = vsyncadd [#allocation7], 4294966784  ;;  %v54_v0 = vld [vmem:[#allocation3] sm:$0xf]  ;;  %s426_s21 = smov 3   ;;  %s427_s24 = smov 5  }
  0x37   :  { %73 = vrot.lane.b32.xlu1 %v54_v0, %s426_s21  ;;  %100 = vst [vmem:[#allocation2 + $0x14] sm:$0xf] %v54_v0  ;;  %55 = vrot.lane.b32.xlu0 %v54_v0, %s427_s24  ;;  %s428_s25 = smov 2   ;;  %s429_s26 = smov 4   ;;  %v146_v1 = vld [vmem:[#allocation8] sm:$0xff]  ;;  %vm154_vm0 = vcmask 359424  }
  0x38   :  { %s430_s27 = smov 127   ;;  %s431_s28 = smov 1   ;;  %293 = vmatprep.mubr.msk.f32.mxu0 %vm154_vm0, %v146_v1  ;;  %v262_v2 = vld [vmem:[#allocation6 + $0x2] ss:$0 sm:$0xff]  ;;  %v260_v3 = vld [vmem:[#allocation6] ss:$0 sm:$0xff] }
  0x39   :  { %s432_s30 = smov 125   ;;  %s433_s2 = smov 126   ;;  %v263_v8 = vld [vmem:[#allocation6 + $0x3] ss:$0 sm:$0xff]  ;;  %v261_v9 = vld [vmem:[#allocation6 + $0x1] ss:$0 sm:$0xff] }
  0x3a   :  { %s434_s29 = smov 123   ;;  %s435_s4 = smov 124   ;;  %v265_v14 = vld [vmem:[#allocation6 + $0x6] ss:$0 sm:$0xff]  ;;  %v264_v15 = vld [vmem:[#allocation6 + $0x4] ss:$0 sm:$0xff] }
  0x3b   :  { %82 = vrot.lane.b32.xlu1 %v54_v0, %s428_s25  ;;  %64 = vrot.lane.b32.xlu0 %v54_v0, %s429_s26  ;;  %v267_v20 = vld [vmem:[#allocation6 + $0x8] ss:$0 sm:$0xff]  ;;  %v266_v21 = vld [vmem:[#allocation6 + $0x7] ss:$0 sm:$0xff]  ;;  %v269_v26 = vld [vmem:[#allocation6 + $0xa] ss:$0 sm:$0xff] }
  0x3c   :  { %v268_v27 = vld [vmem:[#allocation6 + $0x9] ss:$0 sm:$0xff]  ;;  %vm161_vm1 = vcmask 1043456   ;;  %vm436_vm2 = vmmov 1   ;;  %v147_v41 = vld [vmem:[#allocation8 + $0x8] sm:$0x7] }
  0x3d   :  { %vm305_vm3 = vmpackc.low %vm161_vm1, %vm436_vm2  ;;  %s437_s5 = smov [#allocation9]  }
  0x3e   :  { %s247_s6 = sshll.u32 %s437_s5, 4  ;;  %s248_s6 = int_to_ptr.vmem [resolvable:$true] %s247_s6 }
  0x3f   :  { %101 = vrot.lane.b32.xlu1 %v54_v0, %s430_s27  ;;  %91 = vrot.lane.b32.xlu0 %v54_v0, %s431_s28  ;;  %s393_s7 = scalar_lea.vmem %s248_s6, 256  ;;  %p398_p11 = scmp.lt.s32.totalorder %s248_s6, %s248_s6 }
  0x40   :  { %p394_p10 = scmp.ne.s32.totalorder %s248_s6, %s393_s7  ;;  %p399_p12 = scmp.lt.s32.totalorder %s393_s7, %s393_s7 }
  0x42   :  { %p400_p13 = por %p399_p12, %p398_p11 }
  0x43   :  { %119 = vrot.lane.b32.xlu1 %v54_v0, %s432_s30  ;;  %110 = vrot.lane.b32.xlu0 %v54_v0, %s433_s2 }
  0x44   :  { %p401_p0 = pnand %p400_p13, %p394_p10 }
  0x47   :  { %137 = vrot.lane.b32.xlu1 %v54_v0, %s434_s29  ;;  %128 = vrot.lane.b32.xlu0 %v54_v0, %s435_s4 }
  0xa9   :  { %v74_v4 = vpop.permute.xlu1 %73  ;;  %v56_v5 = vpop.permute.xlu0 %55 }
  0xaa   :  { %v80_v6 = vmul.f32 %v262_v2, %v74_v4  ;;  %v62_v7 = vmul.f32 %v260_v3, %v56_v5 }
  0xac   :  { %81 = vst [vmem:[#allocation2 + $0x8] sm:$0xf] %v80_v6  ;;  %63 = vst [vmem:[#allocation2] sm:$0xf] %v62_v7 }
  0xad   :  { %v83_v10 = vpop.permute.xlu1 %82  ;;  %v65_v11 = vpop.permute.xlu0 %64 }
  0xae   :  { %v89_v12 = vmul.f32 %v263_v8, %v83_v10  ;;  %v71_v13 = vmul.f32 %v261_v9, %v65_v11 }
  0xb0   :  { %90 = vst [vmem:[#allocation2 + $0xc] sm:$0xf] %v89_v12  ;;  %72 = vst [vmem:[#allocation2 + $0x4] sm:$0xf] %v71_v13 }
  0xb1   :  { %v102_v16 = vpop.permute.xlu1 %101  ;;  %v92_v17 = vpop.permute.xlu0 %91 }
  0xb2   :  { %v108_v18 = vmul.f32 %v265_v14, %v102_v16  ;;  %v98_v19 = vmul.f32 %v264_v15, %v92_v17 }
  0xb4   :  { %109 = vst [vmem:[#allocation2 + $0x18] sm:$0xf] %v108_v18  ;;  %99 = vst [vmem:[#allocation2 + $0x10] sm:$0xf] %v98_v19 }
  0xb5   :  { %v120_v22 = vpop.permute.xlu1 %119  ;;  %v111_v23 = vpop.permute.xlu0 %110 }
  0xb6   :  { %v126_v24 = vmul.f32 %v267_v20, %v120_v22  ;;  %v117_v25 = vmul.f32 %v266_v21, %v111_v23 }
  0xb7   :  { %v148_v28 = vld [vmem:[#allocation2] sm:$0xff]  ;;  %v149_v29 = vld [vmem:[#allocation2 + $0x8] sm:$0xff] }
  0xb8   :  { %127 = vst [vmem:[#allocation2 + $0x20] sm:$0xf] %v126_v24  ;;  %118 = vst [vmem:[#allocation2 + $0x1c] sm:$0xf] %v117_v25  ;;  %v296_v30 = vpack.c.bf16 %v149_v29, %v148_v28 }
  0xb9   :  { %v138_v31 = vpop.permute.xlu1 %137  ;;  %v129_v32 = vpop.permute.xlu0 %128 }
  0xba   :  { %v144_v33 = vmul.f32 %v269_v26, %v138_v31  ;;  %v135_v34 = vmul.f32 %v268_v27, %v129_v32  ;;  %297 = vmatprep.subr.bf16.mxu0 %v296_v30 }
  0xbb   :  { %299 = vmatpush3.bf16.msra.mxu0 %v296_v30  ;;  %v150_v35 = vld [vmem:[#allocation2 + $0x10] sm:$0xff] }
  0xbc   :  { %145 = vst [vmem:[#allocation2 + $0x28] sm:$0xf] %v144_v33  ;;  %136 = vst [vmem:[#allocation2 + $0x24] sm:$0xf] %v135_v34 }
  0xbf   :  { %v151_v36 = vld [vmem:[#allocation2 + $0x18] sm:$0xff] }
  0xc0   :  { %v300_v37 = vpack.c.bf16 %v151_v36, %v150_v35 }
  0xc2   :  { %301 = vmatprep.subr.bf16.mxu0 %v300_v37 }
  0xc3   :  { %303 = vmatpush3.bf16.msra.mxu0 %v300_v37  ;;  %v152_v38 = vld [vmem:[#allocation2 + $0x20] sm:$0xff]  ;;  %v153_v39 = vld [vmem:[#allocation2 + $0x28] sm:$0xf] }
  0xc4   :  { %v304_v40 = vpack.c.bf16 %v153_v39, %v152_v38 }
  0xc6   :  { %306 = vmatprep.subr.msk.bf16.mxu0 %vm305_vm3, %v304_v40 }
  0xc7   :  { %309 = vmatpush3.bf16.msk.msra.mxu0 %vm305_vm3, %v304_v40 }
  0xca   :  { %294 = vmatmul.mubr.msk.f32.vlgmr.msra.gmra.mrb[0].mxu0 %vm154_vm0, %v147_v41 }
 0x19d   :  { %v295_v42 = vpop.f32.mrb[0].mxu0 }
 0x19e   :  { %241 = vst [vmem:[#allocation9 + $0x8] sm:$0x7] %v295_v42  ;;  %v231_v43 = vpop.f32.mrb[1].mxu0 }
 0x19f   :  { %240 = vst [vmem:[#allocation9] sm:$0xff] %v231_v43 }
 0x1a0   :  { %404 = shalt.err (!%p401_p0)
}
 0x1a1   :  { %s405_s1 = scalar_lea.hbm %s520_s3, 256 }
 0x1a2   :  { %p406_p1 = scmp.ne.s32.totalorder %s520_s3, %s405_s1  ;;  %p409_p2 = scmp.lt.u32.totalorder %s405_s1, %s520_s3 }
 0x1a4   :  { %p411_p3 = pnand %p409_p2, %p406_p1 }
 0x1a6   :  { %414 = shalt.err (!%p411_p3)
}
 0x1a7   :  { %253 = dma.vmem_to_hbm [thread:$0]  %s248_s6, 256, %s520_s3, [#allocation5], %s422_s22, %s422_s22, %s423_s23  }
 0x1a8   :  { %419 = dma.done.wait [#allocation5], 256  }
 0x1a9   :  { %420 = vsyncadd [#allocation5], 4294967040 }
 0x1aa   :  { %257 = vsyncpa [#allocation4], 1 }
 0x1ab   :  { %258 = vsyncpa [#allocation7], 1 }
 0x1ac   :  { %259 = vsyncpa [#allocation5], 1 }

</bundles_post_ra>
